<compile_context>
chip_gen: v6e
topology: v6e:2x2x1
jax: 0.10.0
libtpu: 0.0.40
codegen_flags: <defaults>
</compile_context>

<pallas_src>
import functools

import jax
import jax.numpy as jnp
from jax.experimental import pallas as pl
from jax.experimental.pallas import tpu as pltpu


def _round_up(x, m):
    return (x + m - 1) // m * m


def _spec_gcn_kernel(a_ref, xw_ref, h_ref):
    """One (tile_m, tile_k) x (tile_k, hidden_pad) MXU step of H = A @ XW.

    The output BlockSpec returns the same block index for every k, so the f32
    output tile stays resident in VMEM across the K axis and acts as the
    accumulator (written back to HBM once per row tile).
    """
    k = pl.program_id(1)

    @pl.when(k == 0)
    def _():
        h_ref[...] = jnp.zeros_like(h_ref)

    h_ref[...] += jnp.dot(
        a_ref[...], xw_ref[...], preferred_element_type=jnp.float32
    )


@functools.partial(jax.jit, static_argnames=("tile_m", "tile_k", "compute_dtype"))
def spec_gcn_layer(feature, d_n_a_d_n, w, *, tile_m=512, tile_k=512,
                   compute_dtype=jnp.bfloat16):
    """SpecGCNLayer forward: H = D_n_A_D_n @ (feature @ W)  (eval-mode dropout)."""
    n, input_dim = feature.shape
    hidden_dim = w.shape[1]
    assert d_n_a_d_n.shape == (n, n)
    assert w.shape[0] == input_dim

    # feature_new = feature @ W in f32 (negligible work, keeps X@W accuracy).
    xw = jnp.dot(feature.astype(jnp.float32), w.astype(jnp.float32))
    # (dropout: identity in eval mode -- see TODO(synk) above)

    # Lane-dense output: pad hidden up to a multiple of 128 lanes.
    hidden_pad = _round_up(hidden_dim, 128)

    # 128-aligned tiles, clamped for small graphs (N=128 demo -> single step).
    tm = min(tile_m, _round_up(n, 128))
    tk = min(tile_k, _round_up(n, 128))
    n_pad_m = _round_up(n, tm)
    n_pad_k = _round_up(n, tk)

    # Stream the dominant operand (A) and XW in the compute dtype (bf16 by
    # default).  Production callers with a static graph should pre-cast A to
    # bf16 once and reuse it across calls so the cast is not paid per forward.
    a = d_n_a_d_n.astype(compute_dtype)
    xw = xw.astype(compute_dtype)

    if n_pad_m != n or n_pad_k != n:
        a = jnp.pad(a, ((0, n_pad_m - n), (0, n_pad_k - n)))
    if n_pad_k != n or hidden_pad != hidden_dim:
        xw = jnp.pad(xw, ((0, n_pad_k - n), (0, hidden_pad - hidden_dim)))

    grid = (n_pad_m // tm, n_pad_k // tk)

    h_pad = pl.pallas_call(
        _spec_gcn_kernel,
        out_shape=jax.ShapeDtypeStruct((n_pad_m, hidden_pad), jnp.float32),
        grid_spec=pltpu.PrefetchScalarGridSpec(
            num_scalar_prefetch=0,
            grid=grid,
            in_specs=[
                # (tile_m, tile_k) tile of the normalized adjacency
                pl.BlockSpec((tm, tk), lambda i, k: (i, k)),
                # (tile_k, hidden_pad) slab of XW
                pl.BlockSpec((tk, hidden_pad), lambda i, k: (k, 0)),
            ],
            # Same output block for all k -> resident f32 accumulator.
            out_specs=pl.BlockSpec((tm, hidden_pad), lambda i, k: (i, 0)),
        ),
        compiler_params=pltpu.CompilerParams(
            # Row tiles are independent (sharded across TCs on v7x); the K axis
            # is a sequential reduction into the resident output tile.
            dimension_semantics=("parallel", "arbitrary"),
        ),
    )(a, xw)

    if n_pad_m != n or hidden_pad != hidden_dim:
        h_pad = h_pad[:n, :hidden_dim]
    return h_pad


def xavier_uniform(key, shape, gain=1.414, dtype=jnp.float32):
    """Matches nn.init.xavier_uniform_ for a 2-D (fan_in, fan_out) matrix."""
    fan_in, fan_out = shape
    bound = gain * (6.0 / (fan_in + fan_out)) ** 0.5
    return jax.random.uniform(key, shape, dtype=dtype, minval=-bound, maxval=bound)


if __name__ == "__main__":
    # Small, module-consistent shapes.
    N = 128          # number of graph nodes
    INPUT_DIM = 64   # input feature dimension
    HIDDEN_DIM = 32  # hidden dimension

    root = jax.random.PRNGKey(0)
    k_w, k_x, k_a = jax.random.split(root, 3)

    # Deterministic parameter init (mirrors SpecGCNLayer.__init__).
    W = xavier_uniform(k_w, (INPUT_DIM, HIDDEN_DIM), gain=1.414)

    # Example inputs.
    feature = jax.random.normal(k_x, (N, INPUT_DIM), dtype=jnp.float32)
    # Symmetric, normalized-adjacency-like matrix D^{-1/2} A D^{-1/2}.
    adj = (jax.random.uniform(k_a, (N, N)) < 0.1).astype(jnp.float32)
    adj = adj + adj.T + jnp.eye(N, dtype=jnp.float32)
    adj = jnp.minimum(adj, 1.0)
    deg_inv_sqrt = 1.0 / jnp.sqrt(adj.sum(axis=1))
    d_n_a_d_n = deg_inv_sqrt[:, None] * adj * deg_inv_sqrt[None, :]

    # Reference (pure JAX f32, eval-mode dropout == identity).
    H_ref = d_n_a_d_n @ (feature @ W)

    # 1) Performance path: bf16-streamed A / XW with f32 MXU accumulation.
    H_bf16 = spec_gcn_layer(feature, d_n_a_d_n, W)
    H_bf16 = jax.block_until_ready(H_bf16)
    assert H_bf16.shape == (N, HIDDEN_DIM)
    assert jnp.allclose(H_bf16, H_ref, atol=5e-2, rtol=5e-2)

    # 2) Torch-exact numerics path: full f32 streaming.
    H_f32 = spec_gcn_layer(feature, d_n_a_d_n, W, compute_dtype=jnp.float32)
    H_f32 = jax.block_until_ready(H_f32)
    assert jnp.allclose(H_f32, H_ref, atol=1e-4, rtol=1e-4)

    print("KERNEL_OK")
</pallas_src>

<mosaic_0001>
module attributes {stable_mosaic.version = 11 : i64} {
  func.func @_spec_gcn_kernel(%arg0: i32, %arg1: i32, %arg2: memref<128x128xbf16, #tpu.memory_space<vmem>>, %arg3: memref<128x128xbf16, #tpu.memory_space<vmem>>, %arg4: memref<128x128xf32, #tpu.memory_space<vmem>>) attributes {dimension_semantics = [#tpu.dimension_semantics<parallel>, #tpu.dimension_semantics<arbitrary>], iteration_bounds = array<i64: 1, 1>, scalar_prefetch = 0 : i64, scratch_operands = 0 : i64, tpu.core_type = #tpu.core_type<tc>, window_params = [{transform_indices = @transform_0, window_bounds = array<i64: 128, 128>}, {transform_indices = @transform_1, window_bounds = array<i64: 128, 128>}, {transform_indices = @transform_2, window_bounds = array<i64: 128, 128>}]} {
    %c0_i32 = arith.constant 0 : i32
    %0 = arith.cmpi eq, %arg1, %c0_i32 : i32
    %1 = arith.extui %0 : i1 to i32
    %c0_i32_0 = arith.constant 0 : i32
    %2 = arith.cmpi ne, %1, %c0_i32_0 : i32
    scf.if %2 {
      %cst_8 = arith.constant 0.000000e+00 : f32
      %9 = vector.broadcast %cst_8 : f32 to vector<128x128xf32>
      %c0_9 = arith.constant 0 : index
      %c0_10 = arith.constant 0 : index
      %10 = vector.load %arg4[%c0_9, %c0_10] : memref<128x128xf32, #tpu.memory_space<vmem>>, vector<128x128xf32>
      tpu.vector_store %arg4[%c0_9, %c0_10], %9 {strides = array<i32>} : memref<128x128xf32, #tpu.memory_space<vmem>>, vector<128x128xf32>,
    } else {
    }
    %c0 = arith.constant 0 : index
    %c0_1 = arith.constant 0 : index
    %3 = vector.load %arg4[%c0, %c0_1] : memref<128x128xf32, #tpu.memory_space<vmem>>, vector<128x128xf32>
    %c0_2 = arith.constant 0 : index
    %c0_3 = arith.constant 0 : index
    %4 = vector.load %arg2[%c0_2, %c0_3] : memref<128x128xbf16, #tpu.memory_space<vmem>>, vector<128x128xbf16>
    %c0_4 = arith.constant 0 : index
    %c0_5 = arith.constant 0 : index
    %5 = vector.load %arg3[%c0_4, %c0_5] : memref<128x128xbf16, #tpu.memory_space<vmem>>, vector<128x128xbf16>
    %cst = arith.constant dense<0.000000e+00> : vector<128x128xf32>
    %6 = tpu.matmul %4, %5, %cst {dimension_numbers = #tpu.dot_dimension_numbers<[1], [0], [0], [1], [0, 0, 1, 1], [], []>} : vector<128x128xbf16>, vector<128x128xbf16>, vector<128x128xf32> -> vector<128x128xf32>
    %7 = arith.addf %3, %6 : vector<128x128xf32>
    %c0_6 = arith.constant 0 : index
    %c0_7 = arith.constant 0 : index
    %8 = vector.load %arg4[%c0_6, %c0_7] : memref<128x128xf32, #tpu.memory_space<vmem>>, vector<128x128xf32>
    tpu.vector_store %arg4[%c0_6, %c0_7], %7 {strides = array<i32>} : memref<128x128xf32, #tpu.memory_space<vmem>>, vector<128x128xf32>,
    return
  }
  func.func @transform_0(%arg0: i32, %arg1: i32) -> (i32, i32) {
    %c0_i32 = arith.constant 0 : i32
    return %arg0, %arg1 : i32, i32
  }
  func.func @transform_1(%arg0: i32, %arg1: i32) -> (i32, i32) {
    %c0_i32 = arith.constant 0 : i32
    %c0_i32_0 = arith.constant 0 : i32
    return %arg1, %c0_i32 : i32, i32
  }
  func.func @transform_2(%arg0: i32, %arg1: i32) -> (i32, i32) {
    %c0_i32 = arith.constant 0 : i32
    %c0_i32_0 = arith.constant 0 : i32
    return %arg0, %c0_i32 : i32, i32
  }
}

</mosaic_0001>

<bundles_post_ra>
// kernel: spec_gcn_layer.1
= control target key start
LH: loop header
LB: loop body
LE: loop exit
PB: predicated region body
PF: predicated region fallthrough
CT: control target
= control target key end

     0   :  { %s517_s1 = inlined_call_operand.vmem [shape: bf16[128,128], index: 1, kind: input, shape index: {}]   ;;  %s518_s0 = inlined_call_operand.vmem [shape: bf16[128,128], index: 0, kind: input, shape index: {}]   ;;  %s519_s2 = inlined_call_operand.vmem [shape: f32[128,128], index: 2, kind: output, shape index: {}]  }
   0x1   :  { %v390_v0 = vld [vmem:[%s517_s1 + $0x38] sm:$0xff]   ;;  %v391_v1 = vld [vmem:[%s517_s1 + $0x30] sm:$0xff]   ;;  %v392_v2 = vld [vmem:[%s517_s1 + $0x28] sm:$0xff]  }
   0x2   :  { %341 = vmatprep.subr.bf16.mxu0 %v390_v0  ;;  %373 = vmatprep.subr.bf16.mxu1 %v390_v0  ;;  %v393_v3 = vld [vmem:[%s517_s1 + $0x20] sm:$0xff]   ;;  %v394_v6 = vld [vmem:[%s517_s1 + $0x18] sm:$0xff]   ;;  %v395_v7 = vld [vmem:[%s517_s1 + $0x10] sm:$0xff]  }
   0x3   :  { %342 = vmatpush3.bf16.msra.mxu0 %v390_v0  ;;  %381 = vmatpush3.bf16.msra.mxu1 %v390_v0  ;;  %v398_v4 = vld [vmem:[%s518_s0] sm:$0xff]   ;;  %v396_v8 = vld [vmem:[%s517_s1 + $0x8] sm:$0xff]   ;;  %v402_v12 = vld [vmem:[%s518_s0 + $0x10] sm:$0xff]  }
   0x4   :  { %343 = vmatprep.subr.bf16.mxu0 %v391_v1  ;;  %374 = vmatprep.subr.bf16.mxu1 %v391_v1  ;;  %v399_v5 = vld [vmem:[%s518_s0 + $0x20] sm:$0xff]   ;;  %v400_v10 = vld [vmem:[%s518_s0 + $0x8] sm:$0xff]   ;;  %v403_v13 = vld [vmem:[%s518_s0 + $0x30] sm:$0xff]  }
   0x5   :  { %357 = vmatprep.mubr.bf16.mxu0 %v398_v4  ;;  %365 = vmatprep.mubr.bf16.mxu1 %v399_v5  ;;  %v397_v9 = vld [vmem:[%s517_s1] sm:$0xff]   ;;  %v401_v11 = vld [vmem:[%s518_s0 + $0x28] sm:$0xff]   ;;  %v404_v14 = vld [vmem:[%s518_s0 + $0x18] sm:$0xff]  }
   0x6   :  { %v405_v15 = vld [vmem:[%s518_s0 + $0x38] sm:$0xff]  }
   0x7   :  { %344 = vmatpush3.bf16.msra.mxu0 %v391_v1  ;;  %382 = vmatpush3.bf16.msra.mxu1 %v391_v1 }
   0x8   :  { %345 = vmatprep.subr.bf16.mxu0 %v392_v2  ;;  %375 = vmatprep.subr.bf16.mxu1 %v392_v2 }
   0xb   :  { %346 = vmatpush3.bf16.msra.mxu0 %v392_v2  ;;  %383 = vmatpush3.bf16.msra.mxu1 %v392_v2 }
   0xc   :  { %347 = vmatprep.subr.bf16.mxu0 %v393_v3  ;;  %376 = vmatprep.subr.bf16.mxu1 %v393_v3 }
   0xf   :  { %348 = vmatpush3.bf16.msra.mxu0 %v393_v3  ;;  %384 = vmatpush3.bf16.msra.mxu1 %v393_v3 }
  0x10   :  { %349 = vmatprep.subr.bf16.mxu0 %v394_v6  ;;  %377 = vmatprep.subr.bf16.mxu1 %v394_v6 }
  0x13   :  { %350 = vmatpush3.bf16.msra.mxu0 %v394_v6  ;;  %385 = vmatpush3.bf16.msra.mxu1 %v394_v6 }
  0x14   :  { %351 = vmatprep.subr.bf16.mxu0 %v395_v7  ;;  %378 = vmatprep.subr.bf16.mxu1 %v395_v7 }
  0x17   :  { %352 = vmatpush3.bf16.msra.mxu0 %v395_v7  ;;  %386 = vmatpush3.bf16.msra.mxu1 %v395_v7 }
  0x18   :  { %353 = vmatprep.subr.bf16.mxu0 %v396_v8  ;;  %379 = vmatprep.subr.bf16.mxu1 %v396_v8 }
  0x1b   :  { %354 = vmatpush3.bf16.msra.mxu0 %v396_v8  ;;  %387 = vmatpush3.bf16.msra.mxu1 %v396_v8 }
  0x1c   :  { %355 = vmatprep.subr.bf16.mxu0 %v397_v9  ;;  %380 = vmatprep.subr.bf16.mxu1 %v397_v9 }
  0x1f   :  { %356 = vmatpush3.bf16.msra.mxu0 %v397_v9  ;;  %388 = vmatpush3.bf16.msra.mxu1 %v397_v9 }
  0x22   :  { %358 = vmatmul.mubr.bf16.vlgmr.msra.gmra.mxu0 %v400_v10  ;;  %366 = vmatmul.mubr.bf16.vlgmr.msra.gmra.mxu1 %v401_v11 }
  0x23   :  { %361 = vmatprep.mubr.bf16.mxu0 %v402_v12  ;;  %369 = vmatprep.mubr.bf16.mxu1 %v403_v13 }
  0x2a   :  { %362 = vmatmul.mubr.bf16.gmra.mxu0 %v404_v14  ;;  %370 = vmatmul.mubr.bf16.gmra.mxu1 %v405_v15 }
  0xe2   :  { %v359_v16 = vpop.f32.mrf.mxu0  ;;  %v367_v17 = vpop.f32.mrf.mxu1 }
  0xe3   :  { %291 = vst [vmem:[%s519_s2 + $0x10] sm:$0xff] %v359_v16  ;;  %299 = vst [vmem:[%s519_s2 + $0x50] sm:$0xff] %v367_v17 }
  0xe4   :  { %v210_v18 = vpop.f32.mrf.mxu0  ;;  %v242_v19 = vpop.f32.mrf.mxu1 }
  0xe5   :  { %289 = vst [vmem:[%s519_s2] sm:$0xff] %v210_v18  ;;  %297 = vst [vmem:[%s519_s2 + $0x40] sm:$0xff] %v242_v19 }
  0xe6   :  { %v360_v20 = vpop.f32.mrf.mxu0  ;;  %v368_v21 = vpop.f32.mrf.mxu1 }
  0xe7   :  { %292 = vst [vmem:[%s519_s2 + $0x18] sm:$0xff] %v360_v20  ;;  %300 = vst [vmem:[%s519_s2 + $0x58] sm:$0xff] %v368_v21 }
  0xe8   :  { %v213_v22 = vpop.f32.mrf.mxu0  ;;  %v245_v23 = vpop.f32.mrf.mxu1 }
  0xe9   :  { %290 = vst [vmem:[%s519_s2 + $0x8] sm:$0xff] %v213_v22  ;;  %298 = vst [vmem:[%s519_s2 + $0x48] sm:$0xff] %v245_v23 }
  0xea   :  { %v363_v24 = vpop.f32.mrf.mxu0  ;;  %v371_v25 = vpop.f32.mrf.mxu1 }
  0xeb   :  { %295 = vst [vmem:[%s519_s2 + $0x30] sm:$0xff] %v363_v24  ;;  %303 = vst [vmem:[%s519_s2 + $0x70] sm:$0xff] %v371_v25 }
  0xec   :  { %v226_v26 = vpop.f32.mrf.mxu0  ;;  %v258_v27 = vpop.f32.mrf.mxu1 }
  0xed   :  { %293 = vst [vmem:[%s519_s2 + $0x20] sm:$0xff] %v226_v26  ;;  %301 = vst [vmem:[%s519_s2 + $0x60] sm:$0xff] %v258_v27 }
  0xee   :  { %v364_v28 = vpop.f32.mrf.mxu0  ;;  %v372_v29 = vpop.f32.mrf.mxu1 }
  0xef   :  { %296 = vst [vmem:[%s519_s2 + $0x38] sm:$0xff] %v364_v28  ;;  %304 = vst [vmem:[%s519_s2 + $0x78] sm:$0xff] %v372_v29 }
  0xf0   :  { %v229_v30 = vpop.f32.mrf.mxu0  ;;  %v261_v31 = vpop.f32.mrf.mxu1 }
  0xf1   :  { %294 = vst [vmem:[%s519_s2 + $0x28] sm:$0xff] %v229_v30  ;;  %302 = vst [vmem:[%s519_s2 + $0x68] sm:$0xff] %v261_v31 }

</bundles_post_ra>
